<compile_context>
chip_gen: v7x
topology: tpu7x:2x2x1
jax: 0.10.0
libtpu: 0.0.40
codegen_flags: <defaults>
</compile_context>

<pallas_src>
import jax
import jax.numpy as jnp
from jax.experimental import pallas as pl
from jax.experimental.pallas import tpu as pltpu


# ---------------------------------------------------------------------------
# Static sizes (synthetic config)
# ---------------------------------------------------------------------------
ALPHA_DIM = 8          # config.embed_size['alpha']
XYZ_DIM = 3
TIME_EMBED_DIM = 16    # width of the precomputed time_embedding
JE_WIDTH = 32          # joint_embedding width / output
MAIN_WIDTH = 64
MAIN_OUT = ALPHA_DIM + 8      # main output: alpha slice (8) + scale slice (8)
HEAD_WIDTH = 16               # alpha_net / scale_net hidden width
SCALE_OUT = 3
OUT_PAD = ALPHA_DIM + ALPHA_DIM   # fused output slab: alpha(8) | padded scale(8)

MAX_ROW_TILE = 2048    # sized for v7x (64 MiB VMEM); tiny fraction of VMEM used


def _round_up(x, m):
    return (x + m - 1) // m * m


# ---------------------------------------------------------------------------
# Fully fused AdjustmentNet.forward kernel.
# Ref order:
#   alpha, xyz,
#   joint_embedding: W0_alpha, W0_xyz, b0, W1, b1
#   main:            W0_je, fused_b0(=te@W0_te+b0), W1, b1
#   fused heads:     H_W0(= m_W2 @ blockdiag(a_W0,s_W0)), H_b0,
#                    H_W1(= blockdiag(a_W1, s_W1 zero-padded 3->8)), H_b1
#   out  (rows, 16)
# ---------------------------------------------------------------------------
def _adjustment_fused_kernel(
    alpha_ref, xyz_ref,
    je_w0a, je_w0x, je_b0, je_w1, je_b1,
    m_w0, m_b0f, m_w1, m_b1,
    h_w0, h_b0, h_w1, h_b1,
    out_ref,
):
    f32 = jnp.float32

    # joint_embedding (depth 2, relu hidden): layer 0 consumes the
    # concat(alpha, xyz) input as two split matmuls -> no 11-wide concat array.
    h = (jnp.dot(alpha_ref[...], je_w0a[...], preferred_element_type=f32)
         + jnp.dot(xyz_ref[...], je_w0x[...], preferred_element_type=f32)
         + je_b0[...])
    h = jnp.maximum(h, 0.0)
    je = jnp.dot(h, je_w1[...], preferred_element_type=f32) + je_b1[...]

    # main layers 0/1 (relu).  time_embedding.repeat(N,1) ++ concat is folded
    # into the layer-0 bias (same 1x64 vector for every row).
    h = jnp.maximum(
        jnp.dot(je, m_w0[...], preferred_element_type=f32) + m_b0f[...], 0.0)
    h = jnp.maximum(
        jnp.dot(h, m_w1[...], preferred_element_type=f32) + m_b1[...], 0.0)

    # main layer-2 fused with block-diagonal alpha_net/scale_net layer-0 (+relu)
    h = jnp.maximum(
        jnp.dot(h, h_w0[...], preferred_element_type=f32) + h_b0[...], 0.0)

    # block-diagonal head layer-1 + tanh out-activation.  Scale columns are
    # zero-padded 3 -> 8 (tanh(0)=0), so this IS the final 16-lane slab.
    out = jnp.tanh(jnp.dot(h, h_w1[...], preferred_element_type=f32) + h_b1[...])
    out_ref[...] = out.astype(out_ref.dtype)


# ---------------------------------------------------------------------------
# Deterministic parameter init (PyTorch nn.Linear style uniform bounds)
# ---------------------------------------------------------------------------
def init_linear(key, in_s, out_s):
    kw, kb = jax.random.split(key)
    bound = 1.0 / (in_s ** 0.5)
    w = jax.random.uniform(kw, (in_s, out_s), jnp.float32, -bound, bound)
    b = jax.random.uniform(kb, (1, out_s), jnp.float32, -bound, bound)
    return (w, b)


def init_mlp(key, in_size, out_size, width, depth):
    # mirrors get_net(): in_sizes = [in] + [width]*(depth-1); out = [width]*(depth-1)+[out]
    in_sizes = [in_size] + [width] * (depth - 1)
    out_sizes = [width] * (depth - 1) + [out_size]
    keys = jax.random.split(key, depth)
    return [init_linear(k, i, o) for k, i, o in zip(keys, in_sizes, out_sizes)]


# ---------------------------------------------------------------------------
# AdjustmentNet.forward reimplemented on the fused Pallas kernel
# ---------------------------------------------------------------------------
class AdjustmentNetPallas:
    def __init__(self, key):
        self.sizes = {"alpha": ALPHA_DIM}
        self.schema = {"joint_embedding": {"input": ["alpha", "xyz"]}}
        cfgs = {
            "joint_embedding": dict(in_size=ALPHA_DIM + XYZ_DIM, out_size=JE_WIDTH,
                                    width=JE_WIDTH, depth=2),
            "main": dict(in_size=JE_WIDTH + TIME_EMBED_DIM, out_size=MAIN_OUT,
                         width=MAIN_WIDTH, depth=3),
            "alpha_net": dict(in_size=ALPHA_DIM, out_size=ALPHA_DIM,
                              width=HEAD_WIDTH, depth=2),
            "scale_net": dict(in_size=MAIN_OUT - ALPHA_DIM, out_size=SCALE_OUT,
                              width=HEAD_WIDTH, depth=2),
        }
        keys = jax.random.split(key, len(cfgs))
        self.params = {name: init_mlp(k, **cfg)
                       for (name, cfg), k in zip(cfgs.items(), keys)}
        self._prepack()

    def _prepack(self):
        (je_w0, je_b0), (je_w1, je_b1) = self.params["joint_embedding"]
        je_w0a, je_w0x = je_w0[:ALPHA_DIM], je_w0[ALPHA_DIM:]

        (m_w0, m_b0), (m_w1, m_b1), (m_w2, m_b2) = self.params["main"]
        m_w0_je, m_w0_te = m_w0[:JE_WIDTH], m_w0[JE_WIDTH:]

        (a_w0, a_b0), (a_w1, a_b1) = self.params["alpha_net"]
        (s_w0, s_b0), (s_w1, s_b1) = self.params["scale_net"]

        # Block-diagonal head layer-0 (16 -> 32) and layer-1 (32 -> 16,
        # scale output zero-padded from 3 -> 8 columns).
        w_head0 = jnp.zeros((MAIN_OUT, 2 * HEAD_WIDTH), jnp.float32)
        w_head0 = w_head0.at[:ALPHA_DIM, :HEAD_WIDTH].set(a_w0)
        w_head0 = w_head0.at[ALPHA_DIM:, HEAD_WIDTH:].set(s_w0)
        b_head0 = jnp.concatenate([a_b0, s_b0], axis=-1)          # (1, 32)

        w_head1 = jnp.zeros((2 * HEAD_WIDTH, OUT_PAD), jnp.float32)
        w_head1 = w_head1.at[:HEAD_WIDTH, :ALPHA_DIM].set(a_w1)
        w_head1 = w_head1.at[HEAD_WIDTH:, ALPHA_DIM:ALPHA_DIM + SCALE_OUT].set(s_w1)
        b_head1 = jnp.zeros((1, OUT_PAD), jnp.float32)
        b_head1 = b_head1.at[:, :ALPHA_DIM].set(a_b1)
        b_head1 = b_head1.at[:, ALPHA_DIM:ALPHA_DIM + SCALE_OUT].set(s_b1)

        # Fuse main's last linear (64->16, no activation before the heads):
        #   (h @ m_w2 + m_b2) @ W0 + b0  ==  h @ (m_w2 @ W0) + (m_b2 @ W0 + b0)
        h_w0 = m_w2 @ w_head0                        # (64, 32)
        h_b0 = m_b2 @ w_head0 + b_head0              # (1, 32)

        self._m_w0_te = m_w0_te                      # (16, 64) folded per call
        self._m_b0 = m_b0                            # (1, 64)
        self._pre = (je_w0a, je_w0x, je_b0, je_w1, je_b1, m_w0_je)
        self._post = (m_w1, m_b1, h_w0, h_b0, w_head1, b_head1)

    def forward(self, values, time_embedding):
        values = dict(values)
        input_keys = self.schema["joint_embedding"]["input"]
        a = values["alpha"]
        if "alpha" in input_keys:
            # torch.flatten(alpha, 0, 1)
            a = a.reshape((a.shape[0] * a.shape[1],) + a.shape[2:])
        alpha = a.astype(jnp.float32)
        xyz = values["xyz"].astype(jnp.float32)
        n = alpha.shape[0]

        # Fold time_embedding.repeat(N,1) ++ concat into main's layer-0 bias.
        m_b0f = (time_embedding.astype(jnp.float32) @ self._m_w0_te) + self._m_b0

        # Row tiling: multiple of 8 (f32 sublane), capped for v7x VMEM.
        tile = min(MAX_ROW_TILE, _round_up(n, 8))
        padded_n = _round_up(n, tile)
        if padded_n != n:
            pad_rows = padded_n - n
            alpha = jnp.pad(alpha, ((0, pad_rows), (0, 0)))
            xyz = jnp.pad(xyz, ((0, pad_rows), (0, 0)))
        grid = (padded_n // tile,)

        param_ops = (*self._pre, m_b0f, *self._post)

        def row_spec(feat):
            return pl.BlockSpec((tile, feat), lambda i: (i, 0))

        def const_spec(arr):
            # full-array block, constant index -> stays VMEM-resident across grid
            return pl.BlockSpec(arr.shape, lambda i: (0, 0))

        in_specs = ([row_spec(ALPHA_DIM), row_spec(XYZ_DIM)]
                    + [const_spec(p) for p in param_ops])
        out_specs = pl.BlockSpec((tile, OUT_PAD), lambda i: (i, 0))

        out = pl.pallas_call(
            _adjustment_fused_kernel,
            out_shape=jax.ShapeDtypeStruct((padded_n, OUT_PAD), jnp.float32),
            grid=grid,
            in_specs=in_specs,
            out_specs=out_specs,
            compiler_params=pltpu.CompilerParams(
                dimension_semantics=("parallel",),
                vmem_limit_bytes=32 * 1024 * 1024,
            ),
        )(alpha, xyz, *param_ops)

        a_idx = self.sizes["alpha"]
        return {
            "alpha": out[:n, :a_idx],
            "scale": out[:n, a_idx:a_idx + SCALE_OUT],
        }

    # TODO(synk): get_time_embedding / get_mano_adjustments reuse the same
    # fused-MLP pattern but are not exercised by forward(), so they are omitted.
    # TODO(synk): LogSquish (sign(x)*log2(1+|x|)) is unused in this forward path;
    # verify log2 vs natural log against the reference if it is ever wired in.


# ---------------------------------------------------------------------------
# Pure-JAX reference (same math, unfused original layer structure)
# ---------------------------------------------------------------------------
def _reference_forward(params, values, time_embedding):
    def mlp(x, layers):
        for i, (w, b) in enumerate(layers):
            x = x @ w + b
            if i < len(layers) - 1:
                x = jnp.maximum(x, 0.0)
        return x

    a = values["alpha"]
    alpha = a.reshape((a.shape[0] * a.shape[1],) + a.shape[2:])
    x = jnp.concatenate([alpha, values["xyz"]], axis=-1)
    je = mlp(x, params["joint_embedding"])
    te = jnp.tile(time_embedding, (je.shape[0], 1))
    out = mlp(jnp.concatenate([je, te], axis=-1), params["main"])
    alpha_d = jnp.tanh(mlp(out[:, :ALPHA_DIM], params["alpha_net"]))
    scale_d = jnp.tanh(mlp(out[:, ALPHA_DIM:], params["scale_net"]))
    return {"alpha": alpha_d, "scale": scale_d}


if __name__ == "__main__":
    key = jax.random.PRNGKey(0)
    k_net, k_alpha, k_xyz, k_te = jax.random.split(key, 4)

    net = AdjustmentNetPallas(k_net)

    # small deterministic inputs consistent with forward():
    #   alpha: (2, 4, 8) -> flattened to (8, 8); xyz: (8, 3); time_embedding: (1, 16)
    values = {
        "alpha": jax.random.normal(k_alpha, (2, 4, ALPHA_DIM), jnp.float32),
        "xyz": jax.random.normal(k_xyz, (8, XYZ_DIM), jnp.float32),
    }
    time_embedding = jax.random.normal(k_te, (1, TIME_EMBED_DIM), jnp.float32)

    out = net.forward(values, time_embedding)
    out = jax.tree_util.tree_map(jax.block_until_ready, out)

    assert out["alpha"].shape == (8, ALPHA_DIM)
    assert out["scale"].shape == (8, SCALE_OUT)
    assert bool(jnp.all(jnp.isfinite(out["alpha"])))
    assert bool(jnp.all(jnp.isfinite(out["scale"])))

    ref = _reference_forward(net.params, values, time_embedding)
    assert bool(jnp.allclose(out["alpha"], ref["alpha"], atol=1e-4, rtol=1e-4))
    assert bool(jnp.allclose(out["scale"], ref["scale"], atol=1e-4, rtol=1e-4))

    print("KERNEL_OK")
</pallas_src>

<mosaic_0001>
module attributes {stable_mosaic.version = 11 : i64} {
  func.func @_adjustment_fused_kernel(%arg0: i32, %arg1: memref<8x8xf32, #tpu.memory_space<vmem>>, %arg2: memref<8x3xf32, #tpu.memory_space<vmem>>, %arg3: memref<8x32xf32, #tpu.memory_space<vmem>>, %arg4: memref<3x32xf32, #tpu.memory_space<vmem>>, %arg5: memref<1x32xf32, #tpu.memory_space<vmem>>, %arg6: memref<32x32xf32, #tpu.memory_space<vmem>>, %arg7: memref<1x32xf32, #tpu.memory_space<vmem>>, %arg8: memref<32x64xf32, #tpu.memory_space<vmem>>, %arg9: memref<1x64xf32, #tpu.memory_space<vmem>>, %arg10: memref<64x64xf32, #tpu.memory_space<vmem>>, %arg11: memref<1x64xf32, #tpu.memory_space<vmem>>, %arg12: memref<64x32xf32, #tpu.memory_space<vmem>>, %arg13: memref<1x32xf32, #tpu.memory_space<vmem>>, %arg14: memref<32x16xf32, #tpu.memory_space<vmem>>, %arg15: memref<1x16xf32, #tpu.memory_space<vmem>>, %arg16: memref<8x16xf32, #tpu.memory_space<vmem>>) attributes {dimension_semantics = [#tpu.dimension_semantics<parallel>], iteration_bounds = array<i64: 1>, scalar_prefetch = 0 : i64, scratch_operands = 0 : i64, tpu.core_type = #tpu.core_type<tc>, window_params = [{transform_indices = @transform_0, window_bounds = array<i64: 8, 8>}, {transform_indices = @transform_1, window_bounds = array<i64: 8, 3>}, {pipeline_mode = #tpu.pipeline_mode<synchronous>, transform_indices = @transform_2, window_bounds = array<i64: 8, 32>}, {pipeline_mode = #tpu.pipeline_mode<synchronous>, transform_indices = @transform_3, window_bounds = array<i64: 3, 32>}, {pipeline_mode = #tpu.pipeline_mode<synchronous>, transform_indices = @transform_4, window_bounds = array<i64: 1, 32>}, {pipeline_mode = #tpu.pipeline_mode<synchronous>, transform_indices = @transform_5, window_bounds = array<i64: 32, 32>}, {pipeline_mode = #tpu.pipeline_mode<synchronous>, transform_indices = @transform_6, window_bounds = array<i64: 1, 32>}, {pipeline_mode = #tpu.pipeline_mode<synchronous>, transform_indices = @transform_7, window_bounds = array<i64: 32, 64>}, {pipeline_mode = #tpu.pipeline_mode<synchronous>, transform_indices = @transform_8, window_bounds = array<i64: 1, 64>}, {pipeline_mode = #tpu.pipeline_mode<synchronous>, transform_indices = @transform_9, window_bounds = array<i64: 64, 64>}, {pipeline_mode = #tpu.pipeline_mode<synchronous>, transform_indices = @transform_10, window_bounds = array<i64: 1, 64>}, {pipeline_mode = #tpu.pipeline_mode<synchronous>, transform_indices = @transform_11, window_bounds = array<i64: 64, 32>}, {pipeline_mode = #tpu.pipeline_mode<synchronous>, transform_indices = @transform_12, window_bounds = array<i64: 1, 32>}, {pipeline_mode = #tpu.pipeline_mode<synchronous>, transform_indices = @transform_13, window_bounds = array<i64: 32, 16>}, {pipeline_mode = #tpu.pipeline_mode<synchronous>, transform_indices = @transform_14, window_bounds = array<i64: 1, 16>}, {transform_indices = @transform_15, window_bounds = array<i64: 8, 16>}]} {
    %c0 = arith.constant 0 : index
    %c0_0 = arith.constant 0 : index
    %0 = vector.load %arg1[%c0, %c0_0] : memref<8x8xf32, #tpu.memory_space<vmem>>, vector<8x8xf32>
    %c0_1 = arith.constant 0 : index
    %c0_2 = arith.constant 0 : index
    %1 = vector.load %arg3[%c0_1, %c0_2] : memref<8x32xf32, #tpu.memory_space<vmem>>, vector<8x32xf32>
    %cst = arith.constant dense<0.000000e+00> : vector<8x32xf32>
    %2 = tpu.matmul %0, %1, %cst {dimension_numbers = #tpu.dot_dimension_numbers<[1], [0], [0], [1], [0, 0, 1, 1], [], []>} : vector<8x8xf32>, vector<8x32xf32>, vector<8x32xf32> -> vector<8x32xf32>
    %c0_3 = arith.constant 0 : index
    %c0_4 = arith.constant 0 : index
    %3 = vector.load %arg2[%c0_3, %c0_4] : memref<8x3xf32, #tpu.memory_space<vmem>>, vector<8x3xf32>
    %c0_5 = arith.constant 0 : index
    %c0_6 = arith.constant 0 : index
    %4 = vector.load %arg4[%c0_5, %c0_6] : memref<3x32xf32, #tpu.memory_space<vmem>>, vector<3x32xf32>
    %cst_7 = arith.constant dense<0.000000e+00> : vector<8x32xf32>
    %5 = tpu.matmul %3, %4, %cst_7 {dimension_numbers = #tpu.dot_dimension_numbers<[1], [0], [0], [1], [0, 0, 1, 1], [], []>} : vector<8x3xf32>, vector<3x32xf32>, vector<8x32xf32> -> vector<8x32xf32>
    %6 = arith.addf %2, %5 : vector<8x32xf32>
    %c0_8 = arith.constant 0 : index
    %c0_9 = arith.constant 0 : index
    %7 = vector.load %arg5[%c0_8, %c0_9] : memref<1x32xf32, #tpu.memory_space<vmem>>, vector<1x32xf32>
    %8 = vector.broadcast %7 : vector<1x32xf32> to vector<8x32xf32>
    %9 = arith.addf %6, %8 : vector<8x32xf32>
    %cst_10 = arith.constant 0.000000e+00 : f32
    %10 = vector.broadcast %cst_10 : f32 to vector<8x32xf32>
    %11 = arith.maximumf %9, %10 : vector<8x32xf32>
    %c0_11 = arith.constant 0 : index
    %c0_12 = arith.constant 0 : index
    %12 = vector.load %arg6[%c0_11, %c0_12] : memref<32x32xf32, #tpu.memory_space<vmem>>, vector<32x32xf32>
    %cst_13 = arith.constant dense<0.000000e+00> : vector<8x32xf32>
    %13 = tpu.matmul %11, %12, %cst_13 {dimension_numbers = #tpu.dot_dimension_numbers<[1], [0], [0], [1], [0, 0, 1, 1], [], []>} : vector<8x32xf32>, vector<32x32xf32>, vector<8x32xf32> -> vector<8x32xf32>
    %c0_14 = arith.constant 0 : index
    %c0_15 = arith.constant 0 : index
    %14 = vector.load %arg7[%c0_14, %c0_15] : memref<1x32xf32, #tpu.memory_space<vmem>>, vector<1x32xf32>
    %15 = vector.broadcast %14 : vector<1x32xf32> to vector<8x32xf32>
    %16 = arith.addf %13, %15 : vector<8x32xf32>
    %c0_16 = arith.constant 0 : index
    %c0_17 = arith.constant 0 : index
    %17 = vector.load %arg8[%c0_16, %c0_17] : memref<32x64xf32, #tpu.memory_space<vmem>>, vector<32x64xf32>
    %cst_18 = arith.constant dense<0.000000e+00> : vector<8x64xf32>
    %18 = tpu.matmul %16, %17, %cst_18 {dimension_numbers = #tpu.dot_dimension_numbers<[1], [0], [0], [1], [0, 0, 1, 1], [], []>} : vector<8x32xf32>, vector<32x64xf32>, vector<8x64xf32> -> vector<8x64xf32>
    %c0_19 = arith.constant 0 : index
    %c0_20 = arith.constant 0 : index
    %19 = vector.load %arg9[%c0_19, %c0_20] : memref<1x64xf32, #tpu.memory_space<vmem>>, vector<1x64xf32>
    %20 = vector.broadcast %19 : vector<1x64xf32> to vector<8x64xf32>
    %21 = arith.addf %18, %20 : vector<8x64xf32>
    %cst_21 = arith.constant 0.000000e+00 : f32
    %22 = vector.broadcast %cst_21 : f32 to vector<8x64xf32>
    %23 = arith.maximumf %21, %22 : vector<8x64xf32>
    %c0_22 = arith.constant 0 : index
    %c0_23 = arith.constant 0 : index
    %24 = vector.load %arg10[%c0_22, %c0_23] : memref<64x64xf32, #tpu.memory_space<vmem>>, vector<64x64xf32>
    %cst_24 = arith.constant dense<0.000000e+00> : vector<8x64xf32>
    %25 = tpu.matmul %23, %24, %cst_24 {dimension_numbers = #tpu.dot_dimension_numbers<[1], [0], [0], [1], [0, 0, 1, 1], [], []>} : vector<8x64xf32>, vector<64x64xf32>, vector<8x64xf32> -> vector<8x64xf32>
    %c0_25 = arith.constant 0 : index
    %c0_26 = arith.constant 0 : index
    %26 = vector.load %arg11[%c0_25, %c0_26] : memref<1x64xf32, #tpu.memory_space<vmem>>, vector<1x64xf32>
    %27 = vector.broadcast %26 : vector<1x64xf32> to vector<8x64xf32>
    %28 = arith.addf %25, %27 : vector<8x64xf32>
    %cst_27 = arith.constant 0.000000e+00 : f32
    %29 = vector.broadcast %cst_27 : f32 to vector<8x64xf32>
    %30 = arith.maximumf %28, %29 : vector<8x64xf32>
    %c0_28 = arith.constant 0 : index
    %c0_29 = arith.constant 0 : index
    %31 = vector.load %arg12[%c0_28, %c0_29] : memref<64x32xf32, #tpu.memory_space<vmem>>, vector<64x32xf32>
    %cst_30 = arith.constant dense<0.000000e+00> : vector<8x32xf32>
    %32 = tpu.matmul %30, %31, %cst_30 {dimension_numbers = #tpu.dot_dimension_numbers<[1], [0], [0], [1], [0, 0, 1, 1], [], []>} : vector<8x64xf32>, vector<64x32xf32>, vector<8x32xf32> -> vector<8x32xf32>
    %c0_31 = arith.constant 0 : index
    %c0_32 = arith.constant 0 : index
    %33 = vector.load %arg13[%c0_31, %c0_32] : memref<1x32xf32, #tpu.memory_space<vmem>>, vector<1x32xf32>
    %34 = vector.broadcast %33 : vector<1x32xf32> to vector<8x32xf32>
    %35 = arith.addf %32, %34 : vector<8x32xf32>
    %cst_33 = arith.constant 0.000000e+00 : f32
    %36 = vector.broadcast %cst_33 : f32 to vector<8x32xf32>
    %37 = arith.maximumf %35, %36 : vector<8x32xf32>
    %c0_34 = arith.constant 0 : index
    %c0_35 = arith.constant 0 : index
    %38 = vector.load %arg14[%c0_34, %c0_35] : memref<32x16xf32, #tpu.memory_space<vmem>>, vector<32x16xf32>
    %cst_36 = arith.constant dense<0.000000e+00> : vector<8x16xf32>
    %39 = tpu.matmul %37, %38, %cst_36 {dimension_numbers = #tpu.dot_dimension_numbers<[1], [0], [0], [1], [0, 0, 1, 1], [], []>} : vector<8x32xf32>, vector<32x16xf32>, vector<8x16xf32> -> vector<8x16xf32>
    %c0_37 = arith.constant 0 : index
    %c0_38 = arith.constant 0 : index
    %40 = vector.load %arg15[%c0_37, %c0_38] : memref<1x16xf32, #tpu.memory_space<vmem>>, vector<1x16xf32>
    %41 = vector.broadcast %40 : vector<1x16xf32> to vector<8x16xf32>
    %42 = arith.addf %39, %41 : vector<8x16xf32>
    %43 = math.tanh %42 : vector<8x16xf32>
    %c0_39 = arith.constant 0 : index
    %c0_40 = arith.constant 0 : index
    %44 = vector.load %arg16[%c0_39, %c0_40] : memref<8x16xf32, #tpu.memory_space<vmem>>, vector<8x16xf32>
    tpu.vector_store %arg16[%c0_39, %c0_40], %43 {strides = array<i32>} : memref<8x16xf32, #tpu.memory_space<vmem>>, vector<8x16xf32>,
    return
  }
  func.func @transform_0(%arg0: i32) -> (i32, i32) {
    %c0_i32 = arith.constant 0 : i32
    %c0_i32_0 = arith.constant 0 : i32
    return %arg0, %c0_i32 : i32, i32
  }
  func.func @transform_1(%arg0: i32) -> (i32, i32) {
    %c0_i32 = arith.constant 0 : i32
    %c0_i32_0 = arith.constant 0 : i32
    return %arg0, %c0_i32 : i32, i32
  }
  func.func @transform_2(%arg0: i32) -> (i32, i32) {
    %c0_i32 = arith.constant 0 : i32
    %c0_i32_0 = arith.constant 0 : i32
    %c0_i32_1 = arith.constant 0 : i32
    return %c0_i32, %c0_i32_0 : i32, i32
  }
  func.func @transform_3(%arg0: i32) -> (i32, i32) {
    %c0_i32 = arith.constant 0 : i32
    %c0_i32_0 = arith.constant 0 : i32
    %c0_i32_1 = arith.constant 0 : i32
    return %c0_i32, %c0_i32_0 : i32, i32
  }
  func.func @transform_4(%arg0: i32) -> (i32, i32) {
    %c0_i32 = arith.constant 0 : i32
    %c0_i32_0 = arith.constant 0 : i32
    %c0_i32_1 = arith.constant 0 : i32
    return %c0_i32, %c0_i32_0 : i32, i32
  }
  func.func @transform_5(%arg0: i32) -> (i32, i32) {
    %c0_i32 = arith.constant 0 : i32
    %c0_i32_0 = arith.constant 0 : i32
    %c0_i32_1 = arith.constant 0 : i32
    return %c0_i32, %c0_i32_0 : i32, i32
  }
  func.func @transform_6(%arg0: i32) -> (i32, i32) {
    %c0_i32 = arith.constant 0 : i32
    %c0_i32_0 = arith.constant 0 : i32
    %c0_i32_1 = arith.constant 0 : i32
    return %c0_i32, %c0_i32_0 : i32, i32
  }
  func.func @transform_7(%arg0: i32) -> (i32, i32) {
    %c0_i32 = arith.constant 0 : i32
    %c0_i32_0 = arith.constant 0 : i32
    %c0_i32_1 = arith.constant 0 : i32
    return %c0_i32, %c0_i32_0 : i32, i32
  }
  func.func @transform_8(%arg0: i32) -> (i32, i32) {
    %c0_i32 = arith.constant 0 : i32
    %c0_i32_0 = arith.constant 0 : i32
    %c0_i32_1 = arith.constant 0 : i32
    return %c0_i32, %c0_i32_0 : i32, i32
  }
  func.func @transform_9(%arg0: i32) -> (i32, i32) {
    %c0_i32 = arith.constant 0 : i32
    %c0_i32_0 = arith.constant 0 : i32
    %c0_i32_1 = arith.constant 0 : i32
    return %c0_i32, %c0_i32_0 : i32, i32
  }
  func.func @transform_10(%arg0: i32) -> (i32, i32) {
    %c0_i32 = arith.constant 0 : i32
    %c0_i32_0 = arith.constant 0 : i32
    %c0_i32_1 = arith.constant 0 : i32
    return %c0_i32, %c0_i32_0 : i32, i32
  }
  func.func @transform_11(%arg0: i32) -> (i32, i32) {
    %c0_i32 = arith.constant 0 : i32
    %c0_i32_0 = arith.constant 0 : i32
    %c0_i32_1 = arith.constant 0 : i32
    return %c0_i32, %c0_i32_0 : i32, i32
  }
  func.func @transform_12(%arg0: i32) -> (i32, i32) {
    %c0_i32 = arith.constant 0 : i32
    %c0_i32_0 = arith.constant 0 : i32
    %c0_i32_1 = arith.constant 0 : i32
    return %c0_i32, %c0_i32_0 : i32, i32
  }
  func.func @transform_13(%arg0: i32) -> (i32, i32) {
    %c0_i32 = arith.constant 0 : i32
    %c0_i32_0 = arith.constant 0 : i32
    %c0_i32_1 = arith.constant 0 : i32
    return %c0_i32, %c0_i32_0 : i32, i32
  }
  func.func @transform_14(%arg0: i32) -> (i32, i32) {
    %c0_i32 = arith.constant 0 : i32
    %c0_i32_0 = arith.constant 0 : i32
    %c0_i32_1 = arith.constant 0 : i32
    return %c0_i32, %c0_i32_0 : i32, i32
  }
  func.func @transform_15(%arg0: i32) -> (i32, i32) {
    %c0_i32 = arith.constant 0 : i32
    %c0_i32_0 = arith.constant 0 : i32
    return %arg0, %c0_i32 : i32, i32
  }
}

</mosaic_0001>

<bundles_post_ra>
// kernel: tpu_custom_call.1
= control target key start
LH: loop header
LB: loop body
LE: loop exit
PB: predicated region body
PF: predicated region fallthrough
CT: control target
= control target key end

     0   :  { %20 = vsyncpa [#allocation3], 0  ;;  %s1255_s0 = inlined_call_operand.hbm [shape: f32[8,8], index: 0, kind: input, shape index: {}]   ;;  %s1256_s1 = inlined_call_operand.vmem [shape: f32[8,3], index: 1, kind: input, shape index: {}]   ;;  %s1257_s2 = inlined_call_operand.hbm [shape: f32[8,32], index: 2, kind: input, shape index: {}]   ;;  %s1258_s3 = inlined_call_operand.hbm [shape: f32[3,32], index: 3, kind: input, shape index: {}]   ;;  %s1259_s4 = inlined_call_operand.vmem [shape: f32[1,32], index: 4, kind: input, shape index: {}]   ;;  %s1260_s5 = inlined_call_operand.vmem [shape: f32[32,32], index: 5, kind: input, shape index: {}]   ;;  %s1261_s6 = inlined_call_operand.vmem [shape: f32[1,32], index: 6, kind: input, shape index: {}]   ;;  %s1262_s7 = inlined_call_operand.vmem [shape: f32[32,64], index: 7, kind: input, shape index: {}]   ;;  %s1263_s8 = inlined_call_operand.vmem [shape: f32[1,64], index: 8, kind: input, shape index: {}]   ;;  %s1264_s9 = inlined_call_operand.vmem [shape: f32[64,64], index: 9, kind: input, shape index: {}]   ;;  %s1265_s10 = inlined_call_operand.vmem [shape: f32[1,64], index: 10, kind: input, shape index: {}]   ;;  %s1266_s11 = inlined_call_operand.vmem [shape: f32[64,32], index: 11, kind: input, shape index: {}]   ;;  %s1267_s12 = inlined_call_operand.vmem [shape: f32[1,32], index: 12, kind: input, shape index: {}]   ;;  %s1268_s13 = inlined_call_operand.vmem [shape: f32[32,16], index: 13, kind: input, shape index: {}]   ;;  %s1269_s14 = inlined_call_operand.vmem [shape: f32[1,16], index: 14, kind: input, shape index: {}]   ;;  %s1270_s15 = inlined_call_operand.hbm [shape: f32[8,16], index: 15, kind: output, shape index: {}]  }
   0x1   :  { %21 = vsyncpa [#allocation6], 0 }
   0x2   :  { %22 = vsyncpa [#allocation4], 0  ;;  %s980_s18 = smov [#allocation5]   ;;  %s981_s20 = smov [#allocation2]  }
   0x3   :  { %s41_s19 = sshll.u32 %s980_s18, 4  ;;  %s29_s21 = sshll.u32 %s981_s20, 4  ;;  %s42_s19 = int_to_ptr.vmem [resolvable:$true] %s41_s19  ;;  %s30_s21 = int_to_ptr.vmem [resolvable:$true] %s29_s21 }
   0x4   :  { %s886_s24 = scalar_lea.hbm %s1257_s2, 128 }
   0x5   :  { %p887_p0 = scmp.ne.s32.totalorder %s1257_s2, %s886_s24  ;;  %p890_p1 = scmp.lt.u32.totalorder %s886_s24, %s1257_s2 }
   0x7   :  { %p892_p2 = pnand %p890_p1, %p887_p0 }
   0x9   :  { %895 = shalt.err (!%p892_p2)
}
   0xa   :  { %s896_s29 = scalar_lea.vmem %s42_s19, 128  ;;  %p901_p4 = scmp.lt.s32.totalorder %s42_s19, %s42_s19 }
   0xb   :  { %p897_p3 = scmp.ne.s32.totalorder %s42_s19, %s896_s29  ;;  %p902_p5 = scmp.lt.s32.totalorder %s896_s29, %s896_s29 }
   0xd   :  { %p903_p6 = por %p902_p5, %p901_p4 }
   0xf   :  { %p904_p7 = pnand %p903_p6, %p897_p3 }
  0x11   :  { %907 = shalt.err (!%p904_p7)
}
  0x12   :  { %44 = dma.hbm_to_vmem [thread:$0]  %s1257_s2, 128, %s42_s19, [#allocation6]  }
  0x13   :  { %s908_s20 = scalar_lea.hbm %s1255_s0, 128 }
  0x14   :  { %p909_p8 = scmp.ne.s32.totalorder %s1255_s0, %s908_s20  ;;  %p912_p9 = scmp.lt.u32.totalorder %s908_s20, %s1255_s0 }
  0x16   :  { %p914_p10 = pnand %p912_p9, %p909_p8 }
  0x18   :  { %917 = shalt.err (!%p914_p10)
}
  0x19   :  { %s918_s26 = scalar_lea.vmem %s30_s21, 128  ;;  %p923_p12 = scmp.lt.s32.totalorder %s30_s21, %s30_s21 }
  0x1a   :  { %p919_p11 = scmp.ne.s32.totalorder %s30_s21, %s918_s26  ;;  %p924_p13 = scmp.lt.s32.totalorder %s918_s26, %s918_s26 }
  0x1c   :  { %p925_p0 = por %p924_p13, %p923_p12 }
  0x1e   :  { %p926_p1 = pnand %p925_p0, %p919_p11 }
  0x20   :  { %929 = shalt.err (!%p926_p1)
}
  0x21   :  { %32 = dma.hbm_to_vmem [thread:$0]  %s1255_s0, 128, %s30_s21, [#allocation3]  }
  0x22   :  { %s982_s27 = smov [#allocation7]   ;;  %s930_s16 = scalar_lea.hbm %s1258_s3, 64 }
  0x23   :  { %s51_s28 = sshll.u32 %s982_s27, 4  ;;  %p931_p2 = scmp.ne.s32.totalorder %s1258_s3, %s930_s16  ;;  %s52_s28 = int_to_ptr.vmem [resolvable:$true] %s51_s28 }
  0x24   :  { %p934_p3 = scmp.lt.u32.totalorder %s930_s16, %s1258_s3 }
  0x26   :  { %p936_p4 = pnand %p934_p3, %p931_p2 }
  0x28   :  { %939 = shalt.err (!%p936_p4)
}
  0x29   :  { %s940_s23 = scalar_lea.vmem %s52_s28, 64  ;;  %p945_p6 = scmp.lt.s32.totalorder %s52_s28, %s52_s28 }
  0x2a   :  { %p941_p5 = scmp.ne.s32.totalorder %s52_s28, %s940_s23  ;;  %p946_p7 = scmp.lt.s32.totalorder %s940_s23, %s940_s23 }
  0x2c   :  { %p947_p8 = por %p946_p7, %p945_p6 }
  0x2e   :  { %p948_p9 = pnand %p947_p8, %p941_p5 }
  0x30   :  { %951 = shalt.err (!%p948_p9)
}
  0x31   :  { %54 = dma.hbm_to_vmem [thread:$0]  %s1258_s3, 64, %s52_s28, [#allocation6]  }
  0x32   :  { %974 = dma.done.wait [#allocation3], 128  }
  0x33   :  { %975 = vsyncadd [#allocation3], 4294967168 }
  0x34   :  { %976 = dma.done.wait [#allocation6], 192  }
  0x35   :  { %977 = vsyncadd [#allocation6], 4294967104  ;;  %v983_v0 = vmov 0.0   ;;  %vm984_vm0 = vmmov 0   ;;  %vm94_vm1 = vcmask 1042432   ;;  %vm90_vm2 = vcmask 23552  }
  0x36   :  { %754 = vmatprep.subr.mxu1 %v983_v0  ;;  %756 = vmatprep.mubr.msk.f32.mxu1 %vm984_vm0, %v983_v0  ;;  %v89_v1 = vld [vmem:[#allocation7] sm:$0x7]  ;;  %v88_v2 = vld [vmem:[%s1256_s1] sm:$0xff]  ;;  %v87_v3 = vld [vmem:[#allocation5] sm:$0xff]  ;;  %vm168_vm3 = vcmask 64512   ;;  %v985_v7 = vmov 0.0|0.0  }
  0x37   :  { %772 = vmatprep.mubr.msk.f32.mxu0 %vm984_vm0, %v983_v0  ;;  %755 = vmatpush3.msk.msra.mxu1 %vm94_vm1, %v89_v1  ;;  %v86_v4 = vld [vmem:[#allocation2] sm:$0xff]  ;;  %v252_v6 = vld [vmem:[%s1260_s5 + $0x8] sm:$0xff]  ;;  %v253_v9 = vld [vmem:[%s1260_s5 + $0x10] sm:$0xff]  ;;  %vm262_vm4 = vcmask 261120   ;;  %vm436_vm5 = vcmask 523264   ;;  %vm685_vm6 = vcmask 130048  }
  0x38   :  { %757 = vmatmul.mubr.msk.f32.vlgmr.msra.gmra.mrb[0].mxu1 %vm90_vm2, %v88_v2  ;;  %759 = vmatprep.subr.mxu1 %v983_v0  ;;  %v251_v5 = vld [vmem:[%s1260_s5] sm:$0xff]  ;;  %v254_v10 = vld [vmem:[%s1260_s5 + $0x18] sm:$0xff]  ;;  %v337_v13 = vld [vmem:[%s1262_s7 + $0x8] sm:$0xff] }
  0x39   :  { %760 = vmatpush3.msra.mxu1 %v87_v3  ;;  %761 = vmatprep.mubr.msk.f32.mxu1 %vm984_vm0, %v983_v0  ;;  %v836_v8 = vpack.c.bf16 %v252_v6, %v251_v5  ;;  %v839_v11 = vpack.c.bf16 %v254_v10, %v253_v9  ;;  %v336_v12 = vld [vmem:[%s1262_s7] sm:$0xff]  ;;  %v338_v23 = vld [vmem:[%s1262_s7 + $0x10] sm:$0xff]  ;;  %v339_v24 = vld [vmem:[%s1262_s7 + $0x18] sm:$0xff] }
  0x3a   :  { %835 = vmatprep.subr.bf16.mxu0 %v985_v7  ;;  %841 = vmatprep.subr.bf16.mxu1 %v985_v7  ;;  %v842_v14 = vpack.c.bf16 %v337_v13, %v336_v12  ;;  %v706_v18 = vld [vmem:[%s1259_s4] ss:$0 sm:$0xff]  ;;  %v845_v25 = vpack.c.bf16 %v339_v24, %v338_v23  ;;  %v422_v27 = vld [vmem:[%s1264_s9 + $0x8] sm:$0xff]  ;;  %v423_v28 = vld [vmem:[%s1264_s9 + $0x10] sm:$0xff] }
  0x3b   :  { %837 = vmatpush3.bf16.msra.mxu0 %v836_v8  ;;  %v421_v26 = vld [vmem:[%s1264_s9] sm:$0xff]  ;;  %v424_v30 = vld [vmem:[%s1264_s9 + $0x18] sm:$0xff]  ;;  %v426_v33 = vld [vmem:[%s1264_s9 + $0x28] sm:$0xff] }
  0x3c   :  { %762 = vmatmul.mubr.msk.f32.vlgmr.msra.gmra.mrb[2].mxu1 %vm168_vm3, %v86_v4  ;;  %838 = vmatprep.subr.bf16.mxu0 %v985_v7  ;;  %v848_v29 = vpack.c.bf16 %v422_v27, %v421_v26  ;;  %v851_v31 = vpack.c.bf16 %v424_v30, %v423_v28  ;;  %v425_v32 = vld [vmem:[%s1264_s9 + $0x20] sm:$0xff]  ;;  %v427_v39 = vld [vmem:[%s1264_s9 + $0x30] sm:$0xff]  ;;  %v428_v40 = vld [vmem:[%s1264_s9 + $0x38] sm:$0xff] }
  0x3d   :  { %783 = vmatprep.mubr.msk.f32.mxu1 %vm984_vm0, %v983_v0  ;;  %843 = vmatpush3.bf16.msra.mxu1 %v842_v14  ;;  %v854_v34 = vpack.c.bf16 %v426_v33, %v425_v32  ;;  %v707_v35 = vld [vmem:[%s1261_s6] ss:$0 sm:$0xff]  ;;  %v857_v41 = vpack.c.bf16 %v428_v40, %v427_v39  ;;  %v512_v43 = vld [vmem:[%s1266_s11 + $0x8] sm:$0xff]  ;;  %v513_v44 = vld [vmem:[%s1266_s11 + $0x10] sm:$0xff] }
  0x3e   :  { %844 = vmatprep.subr.bf16.mxu1 %v985_v7  ;;  %v511_v42 = vld [vmem:[%s1266_s11] sm:$0xff]  ;;  %v514_v46 = vld [vmem:[%s1266_s11 + $0x18] sm:$0xff]  ;;  %v516_v49 = vld [vmem:[%s1266_s11 + $0x28] sm:$0xff] }
  0x3f   :  { %840 = vmatpush3.bf16.msra.mxu0 %v839_v11  ;;  %v860_v45 = vpack.c.bf16 %v512_v43, %v511_v42  ;;  %v863_v47 = vpack.c.bf16 %v514_v46, %v513_v44  ;;  %v515_v48 = vld [vmem:[%s1266_s11 + $0x20] sm:$0xff]  ;;  %v517_v56 = vld [vmem:[%s1266_s11 + $0x30] sm:$0xff]  ;;  %v518_v57 = vld [vmem:[%s1266_s11 + $0x38] sm:$0xff] }
  0x40   :  { %847 = vmatprep.subr.bf16.mxu0 %v985_v7  ;;  %v866_v50 = vpack.c.bf16 %v516_v49, %v515_v48  ;;  %v709_v51 = vld [vmem:[%s1263_s8] ss:$0 sm:$0xff]  ;;  %v869_v58 = vpack.c.bf16 %v518_v57, %v517_v56  ;;  %v601_v60 = vld [vmem:[%s1268_s13 + $0x8] sm:$0xff]  ;;  %v602_v3 = vld [vmem:[%s1268_s13 + $0x10] sm:$0xff] }
  0x41   :  { %846 = vmatpush3.bf16.msra.mxu1 %v845_v25  ;;  %v600_v59 = vld [vmem:[%s1268_s13] sm:$0xff]  ;;  %v603_v4 = vld [vmem:[%s1268_s13 + $0x18] sm:$0xff]  ;;  %s986_s13 = smov [#allocation8]  }
  0x42   :  { %859 = vmatprep.subr.bf16.mxu1 %v985_v7  ;;  %v872_v61 = vpack.c.bf16 %v601_v60, %v600_v59  ;;  %v711_v62 = vld [vmem:[%s1265_s10] ss:$0 sm:$0xff]  ;;  %v875_v5 = vpack.c.bf16 %v603_v4, %v602_v3  ;;  %s693_s4 = sshll.u32 %s986_s13, 4  ;;  %s694_s4 = int_to_ptr.vmem [resolvable:$true] %s693_s4 }
  0x43   :  { %v713_v6 = vld [vmem:[%s1267_s12] ss:$0 sm:$0xff]  ;;  %s952_s12 = scalar_lea.vmem %s694_s4, 128  ;;  %p957_p11 = scmp.lt.s32.totalorder %s694_s4, %s694_s4 }
  0x44   :  { %v715_v11 = vld [vmem:[%s1269_s14] ss:$0 sm:$0xff]  ;;  %p953_p10 = scmp.ne.s32.totalorder %s694_s4, %s952_s12  ;;  %p958_p12 = scmp.lt.s32.totalorder %s952_s12, %s952_s12 }
  0x46   :  { %p959_p13 = por %p958_p12, %p957_p11 }
  0x48   :  { %p960_p0 = pnand %p959_p13, %p953_p10 }
 0x10b   :  { %v164_v15 = vpop.f32.mrb[0].mxu1 }
 0x10c   :  { %v758_v16 = vpop.f32.mrb[1].mxu1 }
 0x10f   :  { %v238_v17 = vpop.f32.mrb[2].mxu1 }
 0x110   :  { %v239_v19 = vadd.f32 %v238_v17, %v164_v15  ;;  %v763_v20 = vpop.f32.mrb[3].mxu1 }
 0x112   :  { %v249_v21 = vadd.f32 %v706_v18, %v239_v19 }
 0x114   :  { %v250_v22 = vmax.f32 %v249_v21, 0.0 }
 0x116   :  { %773 = vmatmul.mubr.msk.f32.vlgmr.msra.gmra.mrb[0].mxu0 %vm262_vm4, %v250_v22 }
 0x117   :  { %802 = vmatprep.mubr.msk.f32.mxu0 %vm984_vm0, %v983_v0  ;;  %849 = vmatpush3.bf16.msra.mxu0 %v848_v29 }
 0x118   :  { %850 = vmatprep.subr.bf16.mxu0 %v985_v7 }
 0x11b   :  { %852 = vmatpush3.bf16.msra.mxu0 %v851_v31 }
 0x11c   :  { %853 = vmatprep.subr.bf16.mxu0 %v985_v7 }
 0x11f   :  { %855 = vmatpush3.bf16.msra.mxu0 %v854_v34 }
 0x120   :  { %856 = vmatprep.subr.bf16.mxu0 %v985_v7 }
 0x123   :  { %858 = vmatpush3.bf16.msra.mxu0 %v857_v41 }
 0x124   :  { %871 = vmatprep.subr.bf16.mxu0 %v985_v7 }
 0x1e9   :  { %v332_v36 = vpop.f32.mrb[0].mxu0 }
 0x1ea   :  { %v333_v37 = vadd.f32 %v707_v35, %v332_v36  ;;  %v774_v38 = vpop.f32.mrb[1].mxu0 }
 0x1ec   :  { %784 = vmatmul.mubr.msk.f32.vlgmr.msra.gmra.mrb[4].mxu1 %vm262_vm4, %v333_v37 }
 0x1ed   :  { %821 = vmatprep.mubr.msk.f32.mxu1 %vm984_vm0, %v983_v0  ;;  %861 = vmatpush3.bf16.msra.mxu1 %v860_v45 }
 0x1ee   :  { %862 = vmatprep.subr.bf16.mxu1 %v985_v7 }
 0x1f1   :  { %864 = vmatpush3.bf16.msra.mxu1 %v863_v47 }
 0x1f2   :  { %865 = vmatprep.subr.bf16.mxu1 %v985_v7 }
 0x1f5   :  { %867 = vmatpush3.bf16.msra.mxu1 %v866_v50 }
 0x1f6   :  { %868 = vmatprep.subr.bf16.mxu1 %v985_v7 }
 0x1f9   :  { %870 = vmatpush3.bf16.msra.mxu1 %v869_v58 }
 0x2bf   :  { %v416_v52 = vpop.f32.mrb[4].mxu1 }
 0x2c0   :  { %v417_v53 = vadd.f32 %v709_v51, %v416_v52  ;;  %v785_v54 = vpop.f32.mrb[5].mxu1 }
 0x2c2   :  { %v420_v55 = vmax.f32 %v417_v53, 0.0 }
 0x2c4   :  { %803 = vmatmul.mubr.msk.f32.vlgmr.msra.gmra.mrb[2].mxu0 %vm436_vm5, %v420_v55 }
 0x2c5   :  { %832 = vmatprep.mubr.msk.f32.mxu0 %vm984_vm0, %v983_v0  ;;  %873 = vmatpush3.bf16.msra.mxu0 %v872_v61 }
 0x2c6   :  { %874 = vmatprep.subr.bf16.mxu0 %v985_v7 }
 0x2c9   :  { %876 = vmatpush3.bf16.msra.mxu0 %v875_v5 }
 0x397   :  { %v506_v63 = vpop.f32.mrb[2].mxu0 }
 0x398   :  { %v507_v0 = vadd.f32 %v711_v62, %v506_v63  ;;  %v804_v1 = vpop.f32.mrb[3].mxu0 }
 0x39a   :  { %v510_v2 = vmax.f32 %v507_v0, 0.0 }
 0x39c   :  { %822 = vmatmul.mubr.msk.f32.vlgmr.msra.gmra.mrb[6].mxu1 %vm436_vm5, %v510_v2 }
 0x46f   :  { %v595_v7 = vpop.f32.mrb[6].mxu1 }
 0x470   :  { %v596_v8 = vadd.f32 %v713_v6, %v595_v7  ;;  %v823_v9 = vpop.f32.mrb[7].mxu1 }
 0x472   :  { %v599_v10 = vmax.f32 %v596_v8, 0.0 }
 0x474   :  { %833 = vmatmul.mubr.msk.f32.vlgmr.msra.gmra.mrb[4].mxu0 %vm262_vm4, %v599_v10 }
 0x547   :  { %v680_v12 = vpop.f32.mrb[4].mxu0 }
 0x548   :  { %v681_v13 = vadd.f32 %v715_v11, %v680_v12  ;;  %v834_v14 = vpop.f32.mrb[5].mxu0 }
 0x54a   :  { %884 = vtanh.f32 %v681_v13 }
 0x554   :  { %v885_v15 = vpop.eup %884 }
 0x555   :  { %686 = vst.msk [vmem:[#allocation8] sm:$0xff] %vm685_vm6, %v885_v15 }
 0x556   :  { %963 = shalt.err (!%p960_p0)
}
 0x557   :  { %s964_s14 = scalar_lea.hbm %s1270_s15, 128 }
 0x558   :  { %p965_p1 = scmp.ne.s32.totalorder %s1270_s15, %s964_s14  ;;  %p968_p2 = scmp.lt.u32.totalorder %s964_s14, %s1270_s15 }
 0x55a   :  { %p970_p3 = pnand %p968_p2, %p965_p1 }
 0x55c   :  { %973 = shalt.err (!%p970_p3)
}
 0x55d   :  { %696 = dma.vmem_to_hbm [thread:$0]  %s694_s4, 128, %s1270_s15, [#allocation4]  }
 0x55e   :  { %978 = dma.done.wait [#allocation4], 128  }
 0x55f   :  { %979 = vsyncadd [#allocation4], 4294967168 }
 0x560   :  { %700 = vsyncpa [#allocation3], 1 }
 0x561   :  { %701 = vsyncpa [#allocation6], 1 }
 0x562   :  { %702 = vsyncpa [#allocation4], 1 }

</bundles_post_ra>
